<compile_context>
chip_gen: v7x
topology: tpu7x:2x2x1
jax: 0.10.0
libtpu: 0.0.40
codegen_flags: <defaults>
</compile_context>

<pallas_src>
import math
import functools

import jax
import jax.numpy as jnp
from jax import lax
from jax.experimental import pallas as pl
from jax.experimental.pallas import tpu as pltpu


_MATMUL_DTYPE = jnp.bfloat16            # MXU-native operand dtype
_IMG_TOKENS = 257                        # fixed image-context length in the module


# -----------------------------------------------------------------------------
# Hardware / tiling helpers
# -----------------------------------------------------------------------------
@functools.lru_cache(maxsize=None)
def _vmem_limit_bytes():
    """Per-generation scoped-VMEM limit: ~100 MiB on v5e/v6e, ~56 MiB on v7x."""
    cap = 64 << 20
    try:
        info = pltpu.get_tpu_info()
        cap = int(getattr(info, "vmem_capacity_bytes", cap) or cap)
    except Exception:
        pass
    return max(32 << 20, min(cap - (8 << 20), 100 << 20))


def _round_tile(total, target, mult=8):
    """Tile for a non-reduction axis (Pallas pads/crops the boundary block)."""
    if total <= target:
        return total
    return max(mult, (target // mult) * mult)


def _divisor_tile(total, target, mult=128):
    """Tile for a reduction axis: must exactly divide `total` (no boundary garbage)."""
    if total <= target:
        return total
    for cand in range(target, 0, -1):
        if total % cand == 0 and (cand % mult == 0 or cand == total):
            return cand
    return total


def _heads_per_group(num_heads, head_dim, max_group=8):
    """Largest divisor of num_heads <= max_group whose C-slice is lane aligned."""
    for g in range(min(num_heads, max_group), 0, -1):
        if num_heads % g == 0 and ((g * head_dim) % 128 == 0 or g == num_heads):
            return g
    return num_heads


def _plan_linear(L, Cin, Cout, x_bytes, out_bytes, fuse_norm, budget):
    """Pick ('resident'|'tiled', Lt, Kt, Nt) so the pipeline fits the VMEM budget."""
    slack = 2 << 20

    def lt_for(target):
        return L if L <= target else (target // 8) * 8

    # Mode A: fully VMEM-resident bf16 weight (single copy, fetched once).
    w_bytes = Cin * Cout * 2
    for target in (1024, 512, 256, 128):
        Lt = lt_for(target)
        need = (w_bytes
                + 2 * Lt * Cin * x_bytes        # double-buffered x blocks
                + 2 * Lt * Cout * out_bytes     # double-buffered out blocks
                + Lt * Cout * 4                 # f32 dot result / norm temporaries
                + slack)
        if need <= budget:
            return "resident", Lt, Cin, Cout

    # Mode B: (L, N, K)-tiled with f32 accumulator (weight streamed per L tile).
    if fuse_norm:
        nt_cands = [Cout]                       # RMSNorm reduces over the full Cout
    else:
        nt_cands = sorted({_divisor_tile(Cout, t) for t in (4096, 2048, 1024, 512)},
                          reverse=True)
    kt_cands = sorted({_divisor_tile(Cin, t) for t in (2048, 1024, 512, 256, 128)},
                      reverse=True)
    for target in (1024, 512, 256, 128):
        Lt = lt_for(target)
        for Nt in nt_cands:
            for Kt in kt_cands:
                need = (2 * Lt * Kt * x_bytes   # x blocks
                        + 2 * Kt * Nt * 2       # weight blocks (bf16)
                        + 2 * Lt * Nt * out_bytes
                        + 2 * Lt * Nt * 4       # acc scratch + flush temporaries
                        + slack)
                if need <= budget:
                    return "tiled", Lt, Kt, Nt
    return "tiled", lt_for(128), kt_cands[-1], nt_cands[-1]


# -----------------------------------------------------------------------------
# Linear (+ optional fused WanRMSNorm) kernels
# -----------------------------------------------------------------------------
def _linear_resident_kernel(x_ref, w_ref, b_ref, o_ref):
    x = x_ref[0].astype(_MATMUL_DTYPE)                        # [Lt, Cin]
    y = jnp.dot(x, w_ref[...], preferred_element_type=jnp.float32) + b_ref[...]
    o_ref[...] = y[None].astype(o_ref.dtype)


def _linear_norm_resident_kernel(x_ref, w_ref, b_ref, g_ref, o_ref, *, eps):
    x = x_ref[0].astype(_MATMUL_DTYPE)
    y = jnp.dot(x, w_ref[...], preferred_element_type=jnp.float32) + b_ref[...]
    var = jnp.mean(y * y, axis=-1, keepdims=True)
    y = y * lax.rsqrt(var + eps) * g_ref[...]
    o_ref[...] = y[None].astype(o_ref.dtype)


def _linear_tiled_kernel(x_ref, w_ref, b_ref, o_ref, acc_ref):
    k = pl.program_id(3)

    @pl.when(k == 0)
    def _():
        acc_ref[...] = jnp.zeros_like(acc_ref)

    acc_ref[...] += jnp.dot(x_ref[0].astype(_MATMUL_DTYPE), w_ref[...],
                            preferred_element_type=jnp.float32)

    @pl.when(k == pl.num_programs(3) - 1)
    def _():
        o_ref[...] = (acc_ref[...] + b_ref[...])[None].astype(o_ref.dtype)


def _linear_norm_tiled_kernel(x_ref, w_ref, b_ref, g_ref, o_ref, acc_ref, *, eps):
    k = pl.program_id(3)

    @pl.when(k == 0)
    def _():
        acc_ref[...] = jnp.zeros_like(acc_ref)

    acc_ref[...] += jnp.dot(x_ref[0].astype(_MATMUL_DTYPE), w_ref[...],
                            preferred_element_type=jnp.float32)

    @pl.when(k == pl.num_programs(3) - 1)
    def _():
        y = acc_ref[...] + b_ref[...]
        var = jnp.mean(y * y, axis=-1, keepdims=True)
        y = y * lax.rsqrt(var + eps) * g_ref[...]
        o_ref[...] = y[None].astype(o_ref.dtype)


def pallas_linear(x, w, bias, gamma=None, *, eps=1e-6, out_dtype=None):
    """x: [B, L, Cin] -> [B, L, Cout]; if gamma is given, fuse WanRMSNorm."""
    B, L, Cin = x.shape
    Cout = w.shape[1]
    out_dtype = out_dtype or x.dtype

    # No-ops with prepared params (pre-cast / pre-reshaped once at prepare time).
    if w.dtype != _MATMUL_DTYPE:
        w = w.astype(_MATMUL_DTYPE)
    bias = jnp.asarray(bias, jnp.float32).reshape(1, Cout)
    if gamma is not None:
        gamma = jnp.asarray(gamma, jnp.float32).reshape(1, Cout)

    limit = _vmem_limit_bytes()
    budget = int(limit * 0.85)
    out_bytes = jax.dtypes.canonicalize_dtype(out_dtype).itemsize
    mode, Lt, Kt, Nt = _plan_linear(L, Cin, Cout, x.dtype.itemsize, out_bytes,
                                    gamma is not None, budget)
    nL = pl.cdiv(L, Lt)

    if mode == "resident":
        # Weight (and bias/gamma) live untiled in VMEM for the whole kernel:
        # single copy, fetched once, never re-streamed per L tile.
        in_specs = [
            pl.BlockSpec((1, Lt, Cin), lambda b, l: (b, l, 0)),
            pl.BlockSpec(memory_space=pltpu.MemorySpace.VMEM),
            pl.BlockSpec(memory_space=pltpu.MemorySpace.VMEM),
        ]
        args = [x, w, bias]
        if gamma is None:
            kernel = _linear_resident_kernel
        else:
            kernel = functools.partial(_linear_norm_resident_kernel, eps=eps)
            in_specs.append(pl.BlockSpec(memory_space=pltpu.MemorySpace.VMEM))
            args.append(gamma)
        return pl.pallas_call(
            kernel,
            out_shape=jax.ShapeDtypeStruct((B, L, Cout), out_dtype),
            grid=(B, nL),
            in_specs=in_specs,
            out_specs=pl.BlockSpec((1, Lt, Cout), lambda b, l: (b, l, 0)),
            compiler_params=pltpu.CompilerParams(
                dimension_semantics=("parallel", "parallel"),
                vmem_limit_bytes=limit),
        )(*args)

    # Tiled mode: grid (B, L-tiles, N-tiles, K-tiles); f32 accumulator over K.
    nN = Cout // Nt
    nK = Cin // Kt
    in_specs = [
        pl.BlockSpec((1, Lt, Kt), lambda b, l, n, k: (b, l, k)),
        pl.BlockSpec((Kt, Nt), lambda b, l, n, k: (k, n)),
        pl.BlockSpec((1, Nt), lambda b, l, n, k: (0, n)),
    ]
    args = [x, w, bias]
    if gamma is None:
        kernel = _linear_tiled_kernel
    else:
        kernel = functools.partial(_linear_norm_tiled_kernel, eps=eps)
        in_specs.append(pl.BlockSpec((1, Nt), lambda b, l, n, k: (0, n)))
        args.append(gamma)
    return pl.pallas_call(
        kernel,
        out_shape=jax.ShapeDtypeStruct((B, L, Cout), out_dtype),
        grid=(B, nL, nN, nK),
        in_specs=in_specs,
        out_specs=pl.BlockSpec((1, Lt, Nt), lambda b, l, n, k: (b, l, n)),
        scratch_shapes=[pltpu.VMEM((Lt, Nt), jnp.float32)],
        compiler_params=pltpu.CompilerParams(
            dimension_semantics=("parallel", "parallel", "parallel", "arbitrary"),
            vmem_limit_bytes=limit),
    )(*args)


# -----------------------------------------------------------------------------
# Fused image + text cross-attention kernel (head-grouped, [B, L, C] layout)
# -----------------------------------------------------------------------------
def _fused_cross_attn_kernel(lens_ref, q_ref, ki_ref, vi_ref, kt_ref, vt_ref,
                             o_ref, *, heads, head_dim, img_len):
    b = pl.program_id(0)
    txt_len = lens_ref[b]                                     # SMEM scalar
    txt_valid = (txt_len > 0).astype(jnp.float32)             # zero output if len == 0

    li_pad = ki_ref.shape[1]                                  # padded image length
    lk_txt = kt_ref.shape[1]

    # Masks hoisted out of the head loop (broadcast by jnp.where, no full iota).
    img_mask = None
    if li_pad > img_len:
        img_mask = lax.broadcasted_iota(jnp.int32, (1, li_pad), 1) < img_len
    txt_mask = lax.broadcasted_iota(jnp.int32, (1, lk_txt), 1) < txt_len

    dn = (((1,), (1,)), ((), ()))  # q @ k^T: contract head_dim, no relayout of k

    # Softmax scale is already folded into the q projection (gamma_q * 1/sqrt(d)).
    for h in range(heads):
        lo = h * head_dim
        hi = lo + head_dim
        qh = q_ref[0, :, lo:hi]                               # [Lq, d] bf16

        # ---- image context (k_lens=None: attend to all 257 real tokens) ----
        si = lax.dot_general(qh, ki_ref[0, :, lo:hi], dn,
                             preferred_element_type=jnp.float32)   # [Lq, Li_pad]
        if img_mask is not None:
            si = jnp.where(img_mask, si, -1e30)
        mi = jnp.max(si, axis=-1, keepdims=True)
        pi = jnp.exp(si - mi)
        deni = jnp.sum(pi, axis=-1, keepdims=True)
        oi = jnp.dot(pi.astype(_MATMUL_DTYPE), vi_ref[0, :, lo:hi],
                     preferred_element_type=jnp.float32)
        oi = oi * (1.0 / deni)                                # exact; [Lq,1] divides

        # ---- text context (masked to context_lens[b]) ----
        st = lax.dot_general(qh, kt_ref[0, :, lo:hi], dn,
                             preferred_element_type=jnp.float32)   # [Lq, Lt]
        st = jnp.where(txt_mask, st, -1e30)
        mt = jnp.max(st, axis=-1, keepdims=True)
        pt = jnp.exp(st - mt)
        dent = jnp.sum(pt, axis=-1, keepdims=True)
        ot = jnp.dot(pt.astype(_MATMUL_DTYPE), vt_ref[0, :, lo:hi],
                     preferred_element_type=jnp.float32)
        ot = ot * (txt_valid / dent)

        # Direct lane-aligned per-head store (no concat, stores spread over the loop).
        o_ref[0, :, lo:hi] = (oi + ot).astype(o_ref.dtype)


def pallas_fused_cross_attention(q, k_txt, v_txt, k_img, v_img, txt_lens,
                                 num_heads, *, img_len, lq_tile=512, out_dtype=None):
    """q: [B, Lq, C]; k/v_txt: [B, Lt, C]; k/v_img: [B, Li_pad, C] -> [B, Lq, C]."""
    B, Lq, C = q.shape
    L_txt = k_txt.shape[1]
    L_img = k_img.shape[1]
    d = C // num_heads
    out_dtype = out_dtype or q.dtype

    hg = _heads_per_group(num_heads, d)       # 4-8 heads per grid step
    Cg = hg * d
    nG = num_heads // hg
    Lqt = _round_tile(Lq, lq_tile, mult=8)
    nLq = pl.cdiv(Lq, Lqt)

    kernel = functools.partial(_fused_cross_attn_kernel,
                               heads=hg, head_dim=d, img_len=img_len)

    # Grid order (B, head-group, Lq-tile): with Lq innermost, the per-(b, g) K/V
    # blocks keep the same block index across Lq steps, so Pallas fetches them once.
    return pl.pallas_call(
        kernel,
        out_shape=jax.ShapeDtypeStruct((B, Lq, C), out_dtype),
        grid_spec=pltpu.PrefetchScalarGridSpec(
            num_scalar_prefetch=1,
            grid=(B, nG, nLq),
            in_specs=[
                pl.BlockSpec((1, Lqt, Cg), lambda b, g, l, lens: (b, l, g)),
                pl.BlockSpec((1, L_img, Cg), lambda b, g, l, lens: (b, 0, g)),
                pl.BlockSpec((1, L_img, Cg), lambda b, g, l, lens: (b, 0, g)),
                pl.BlockSpec((1, L_txt, Cg), lambda b, g, l, lens: (b, 0, g)),
                pl.BlockSpec((1, L_txt, Cg), lambda b, g, l, lens: (b, 0, g)),
            ],
            out_specs=pl.BlockSpec((1, Lqt, Cg), lambda b, g, l, lens: (b, l, g)),
        ),
        compiler_params=pltpu.CompilerParams(
            dimension_semantics=("parallel", "parallel", "arbitrary"),
            vmem_limit_bytes=_vmem_limit_bytes()),
    )(txt_lens.astype(jnp.int32), q, k_img, v_img, k_txt, v_txt)


# -----------------------------------------------------------------------------
# Parameter handling
# -----------------------------------------------------------------------------
def init_params(key, dim):
    ks = jax.random.split(key, 12)

    def lin(kw, kb):
        # stored as [Cin, Cout] (transposed vs torch's [out, in])
        w = jax.random.normal(kw, (dim, dim), jnp.float32) * 0.02
        b = jax.random.normal(kb, (dim,), jnp.float32) * 0.02
        return w, b

    p = {}
    p["wq"], p["bq"] = lin(ks[0], ks[1])
    p["wk"], p["bk"] = lin(ks[2], ks[3])
    p["wv"], p["bv"] = lin(ks[4], ks[5])
    p["wo"], p["bo"] = lin(ks[6], ks[7])
    p["wk_img"], p["bk_img"] = lin(ks[8], ks[9])
    p["wv_img"], p["bv_img"] = lin(ks[10], ks[11])
    # WanRMSNorm weights init to ones (as in the module's __init__)
    p["gq"] = jnp.ones((dim,), jnp.float32)
    p["gk"] = jnp.ones((dim,), jnp.float32)
    p["gk_img"] = jnp.ones((dim,), jnp.float32)
    return p


def prepare_params(params, num_heads):
    """One-time hoist of dtype casts / reshapes + fold softmax scale into gamma_q."""
    dim = params["wq"].shape[0]
    head_dim = dim // num_heads
    scale = 1.0 / math.sqrt(head_dim)

    p = {}
    for name in ("q", "k", "v", "o", "k_img", "v_img"):
        p["w" + name] = params["w" + name].astype(_MATMUL_DTYPE)
        p["b" + name] = params["b" + name].astype(jnp.float32).reshape(1, dim)
    p["gq"] = (params["gq"].astype(jnp.float32) * scale).reshape(1, dim)
    p["gk"] = params["gk"].astype(jnp.float32).reshape(1, dim)
    p["gk_img"] = params["gk_img"].astype(jnp.float32).reshape(1, dim)
    return p


# -----------------------------------------------------------------------------
# WanI2VCrossAttention forward
# -----------------------------------------------------------------------------
def wan_i2v_cross_attention(params, x, context, context_lens, num_heads, eps=1e-6):
    """
    params:       output of prepare_params (bf16 weights, f32 (1,C) biases/gammas,
                  softmax scale pre-folded into gq).
    x:            [B, L1, C]
    context:      [B, L2, C]  (first 257 tokens = image context, rest = text)
    context_lens: int32 [B]   (valid lengths of the text context)
    """
    assert context.shape[1] > _IMG_TOKENS, "context must contain text tokens after 257"

    inter = _MATMUL_DTYPE  # intermediates stored bf16 (MXU-native, halves HBM traffic)

    # Pad image context 257 -> 384 (lane-friendly score tiles); masked in-kernel.
    img_pad = ((_IMG_TOKENS + 127) // 128) * 128
    context_img = context[:, :_IMG_TOKENS].astype(inter)
    context_img = jnp.pad(context_img, ((0, 0), (0, img_pad - _IMG_TOKENS), (0, 0)))
    context_txt = context[:, _IMG_TOKENS:].astype(inter)
    x_b = x.astype(inter)

    q = pallas_linear(x_b, params["wq"], params["bq"], params["gq"],
                      eps=eps, out_dtype=inter)
    k = pallas_linear(context_txt, params["wk"], params["bk"], params["gk"],
                      eps=eps, out_dtype=inter)
    v = pallas_linear(context_txt, params["wv"], params["bv"], out_dtype=inter)
    k_img = pallas_linear(context_img, params["wk_img"], params["bk_img"],
                          params["gk_img"], eps=eps, out_dtype=inter)
    v_img = pallas_linear(context_img, params["wv_img"], params["bv_img"],
                          out_dtype=inter)

    attn = pallas_fused_cross_attention(q, k, v, k_img, v_img, context_lens,
                                        num_heads, img_len=_IMG_TOKENS,
                                        out_dtype=inter)

    # TODO(synk): optionally fuse this projection into the attention epilogue on
    # v5e/v6e (resident bf16 Wo); kept separate so it stays valid on v7x's 64 MiB VMEM.
    out = pallas_linear(attn, params["wo"], params["bo"], out_dtype=x.dtype)
    return out


# -----------------------------------------------------------------------------
# Demo
# -----------------------------------------------------------------------------
if __name__ == "__main__":
    B = 2
    L1 = 16          # query sequence length
    L2 = 257 + 8     # context: 257 image tokens + 8 text tokens
    dim = 32
    num_heads = 4

    key = jax.random.PRNGKey(0)
    kp, kx, kc = jax.random.split(key, 3)
    params = prepare_params(init_params(kp, dim), num_heads)

    x = jax.random.normal(kx, (B, L1, dim), jnp.float32)
    context = jax.random.normal(kc, (B, L2, dim), jnp.float32)
    context_lens = jnp.array([8, 5], dtype=jnp.int32)  # valid text-context lengths

    out = wan_i2v_cross_attention(params, x, context, context_lens, num_heads)
    out = jax.block_until_ready(out)
    assert out.shape == (B, L1, dim)
    assert bool(jnp.all(jnp.isfinite(out)))
    print("KERNEL_OK")
</pallas_src>

<mosaic_0001>
module attributes {stable_mosaic.version = 11 : i64} {
  func.func @_linear_norm_resident_kernel(%arg0: i32, %arg1: i32, %arg2: memref<1x16x32xbf16, #tpu.memory_space<vmem>>, %arg3: memref<32x32xbf16, #tpu.memory_space<vmem>>, %arg4: memref<1x32xf32, #tpu.memory_space<vmem>>, %arg5: memref<1x32xf32, #tpu.memory_space<vmem>>, %arg6: memref<1x16x32xbf16, #tpu.memory_space<vmem>>) attributes {dimension_semantics = [#tpu.dimension_semantics<parallel>, #tpu.dimension_semantics<parallel>], iteration_bounds = array<i64: 2, 1>, scalar_prefetch = 0 : i64, scratch_operands = 0 : i64, tpu.core_type = #tpu.core_type<tc>, window_params = [{transform_indices = @transform_0, window_bounds = array<i64: 1, 16, 32>}, {pipeline_mode = #tpu.pipeline_mode<synchronous>, transform_indices = @transform_1, window_bounds = array<i64: 32, 32>}, {pipeline_mode = #tpu.pipeline_mode<synchronous>, transform_indices = @transform_2, window_bounds = array<i64: 1, 32>}, {pipeline_mode = #tpu.pipeline_mode<synchronous>, transform_indices = @transform_3, window_bounds = array<i64: 1, 32>}, {transform_indices = @transform_4, window_bounds = array<i64: 1, 16, 32>}]} {
    %c0 = arith.constant 0 : index
    %c0_0 = arith.constant 0 : index
    %c0_1 = arith.constant 0 : index
    %0 = vector.load %arg2[%c0, %c0_0, %c0_1] : memref<1x16x32xbf16, #tpu.memory_space<vmem>>, vector<1x16x32xbf16>
    %1 = vector.shape_cast %0 : vector<1x16x32xbf16> to vector<16x32xbf16>
    %c0_2 = arith.constant 0 : index
    %c0_3 = arith.constant 0 : index
    %2 = vector.load %arg3[%c0_2, %c0_3] : memref<32x32xbf16, #tpu.memory_space<vmem>>, vector<32x32xbf16>
    %cst = arith.constant dense<0.000000e+00> : vector<16x32xf32>
    %3 = tpu.matmul %1, %2, %cst {dimension_numbers = #tpu.dot_dimension_numbers<[1], [0], [0], [1], [0, 0, 1, 1], [], []>} : vector<16x32xbf16>, vector<32x32xbf16>, vector<16x32xf32> -> vector<16x32xf32>
    %c0_4 = arith.constant 0 : index
    %c0_5 = arith.constant 0 : index
    %4 = vector.load %arg4[%c0_4, %c0_5] : memref<1x32xf32, #tpu.memory_space<vmem>>, vector<1x32xf32>
    %5 = vector.broadcast %4 : vector<1x32xf32> to vector<16x32xf32>
    %6 = arith.addf %3, %5 : vector<16x32xf32>
    %7 = arith.mulf %6, %6 : vector<16x32xf32>
    %cst_6 = arith.constant dense<0.000000e+00> : vector<16xf32>
    %8 = vector.multi_reduction <add>, %7, %cst_6 [1] : vector<16x32xf32> to vector<16xf32>
    %9 = vector.shape_cast %8 : vector<16xf32> to vector<16x1xf32>
    %cst_7 = arith.constant 3.200000e+01 : f32
    %10 = vector.broadcast %cst_7 : f32 to vector<16x1xf32>
    %11 = arith.divf %9, %10 : vector<16x1xf32>
    %cst_8 = arith.constant 9.99999997E-7 : f32
    %12 = vector.broadcast %cst_8 : f32 to vector<16x1xf32>
    %13 = arith.addf %11, %12 : vector<16x1xf32>
    %14 = math.rsqrt %13 : vector<16x1xf32>
    %15 = vector.broadcast %14 : vector<16x1xf32> to vector<16x32xf32>
    %16 = arith.mulf %6, %15 : vector<16x32xf32>
    %c0_9 = arith.constant 0 : index
    %c0_10 = arith.constant 0 : index
    %17 = vector.load %arg5[%c0_9, %c0_10] : memref<1x32xf32, #tpu.memory_space<vmem>>, vector<1x32xf32>
    %18 = vector.broadcast %17 : vector<1x32xf32> to vector<16x32xf32>
    %19 = arith.mulf %16, %18 : vector<16x32xf32>
    %20 = vector.shape_cast %19 : vector<16x32xf32> to vector<1x16x32xf32>
    %21 = arith.truncf %20 : vector<1x16x32xf32> to vector<1x16x32xbf16>
    %c0_11 = arith.constant 0 : index
    %c0_12 = arith.constant 0 : index
    %c0_13 = arith.constant 0 : index
    %22 = vector.load %arg6[%c0_11, %c0_12, %c0_13] : memref<1x16x32xbf16, #tpu.memory_space<vmem>>, vector<1x16x32xbf16>
    tpu.vector_store %arg6[%c0_11, %c0_12, %c0_13], %21 {strides = array<i32>} : memref<1x16x32xbf16, #tpu.memory_space<vmem>>, vector<1x16x32xbf16>,
    return
  }
  func.func @transform_0(%arg0: i32, %arg1: i32) -> (i32, i32, i32) {
    %c0_i32 = arith.constant 0 : i32
    %c0_i32_0 = arith.constant 0 : i32
    return %arg0, %arg1, %c0_i32 : i32, i32, i32
  }
  func.func @transform_1(%arg0: i32, %arg1: i32) -> (i32, i32) {
    %c0_i32 = arith.constant 0 : i32
    %c0_i32_0 = arith.constant 0 : i32
    %c0_i32_1 = arith.constant 0 : i32
    return %c0_i32, %c0_i32_0 : i32, i32
  }
  func.func @transform_2(%arg0: i32, %arg1: i32) -> (i32, i32) {
    %c0_i32 = arith.constant 0 : i32
    %c0_i32_0 = arith.constant 0 : i32
    %c0_i32_1 = arith.constant 0 : i32
    return %c0_i32, %c0_i32_0 : i32, i32
  }
  func.func @transform_3(%arg0: i32, %arg1: i32) -> (i32, i32) {
    %c0_i32 = arith.constant 0 : i32
    %c0_i32_0 = arith.constant 0 : i32
    %c0_i32_1 = arith.constant 0 : i32
    return %c0_i32, %c0_i32_0 : i32, i32
  }
  func.func @transform_4(%arg0: i32, %arg1: i32) -> (i32, i32, i32) {
    %c0_i32 = arith.constant 0 : i32
    %c0_i32_0 = arith.constant 0 : i32
    return %arg0, %arg1, %c0_i32 : i32, i32, i32
  }
}

</mosaic_0001>

<bundles_post_ra>
// kernel: tpu_custom_call.1
= control target key start
LH: loop header
LB: loop body
LE: loop exit
PB: predicated region body
PF: predicated region fallthrough
CT: control target
= control target key end

     0   :  { %9 = vsyncpa [#allocation3], 0  ;;  %s1018_s0 = inlined_call_operand.hbm [shape: bf16[2,16,32], index: 0, kind: input, shape index: {}]   ;;  %s1019_s1 = inlined_call_operand.hbm [shape: bf16[32,32], index: 1, kind: input, shape index: {}]   ;;  %s1020_s2 = inlined_call_operand.vmem [shape: f32[1,32], index: 2, kind: input, shape index: {}]   ;;  %s1021_s3 = inlined_call_operand.vmem [shape: f32[1,32], index: 3, kind: input, shape index: {}]   ;;  %s1022_s4 = inlined_call_operand.hbm [shape: bf16[2,16,32], index: 4, kind: output, shape index: {}]  }
   0x1   :  { %11 = vsyncpa [#allocation3 + $0x1], 0 }
   0x2   :  { %12 = vsyncpa [#allocation6], 0 }
   0x3   :  { %13 = vsyncpa [#allocation4], 0 }
   0x4   :  { %15 = vsyncpa [#allocation4 + $0x1], 0  ;;  %s783_s15 = smov 0   ;;  %s785_s16 = smov 0  }
   0x5   :  { %s787_s17 = smov 0   ;;  %s789_s18 = smov 0  }
   0x6   :  { %s791_s19 = smov 0   ;;  %s793_s20 = smov 0  }
   0x7 LB: > { %s477_s21 = sadd.s32 4294967295, %s747_s20   ;;  %s478_s22 = sadd.s32 4294967294, %s747_s20   ;;  %s747_s20 = sphi %s793_s20, %s21_s20   ;;  %s743_s19 = sphi %s791_s19, %s1046_s19   ;;  %s739_s18 = sphi %s789_s18, %s1045_s18   ;;  %s735_s17 = sphi %s787_s17, %s1044_s17   ;;  %s731_s16 = sphi %s785_s16, %s1043_s16   ;;  %s727_s15 = sphi %s783_s15, %s1042_s15  }
   0x8   : > { %p55_p0 = scmp.ne.s32.totalorder %s731_s16, %s727_s15  ;;  %p817_p1 = scmp.eq.s32.totalorder %s477_s21, 0 }
   0x9   : > { %p821_p2 = scmp.eq.s32.totalorder %s477_s21, 1  ;;  %p150_p3 = scmp.eq.s32.totalorder %s478_s22, 1 }
   0xa   : > { %s1027_s23 = scalar_select %p817_p1, 1, 0 }
   0xb   : > { %s1028_s24 = scalar_select %p821_p2, 1, 0 }
   0xc   : > { %p827_p4 = por %p817_p1, %p55_p0  ;;  %p479_p5 = scmp.ge.s32.totalorder %s747_s20, 1 }
   0xd   : > { %p832_p6 = por %p150_p3, %p55_p0  ;;  %p157_p7 = scmp.lt.s32.totalorder %s747_s20, 3 }
   0xe   : > { %s1029_s25 = scalar_select %p827_p4, 1, 0 }
   0xf   : > { %s1030_s26 = scalar_select %p832_p6, 1, 0 }
  0x10   : > { %p837_p8 = pnand %p479_p5, %p157_p7  ;;  %s749_s28 = smov [#allocation5]  }
  0x11   : > { %s169_s29 = sshll.u32 %s749_s28, 4  ;;  %s33_s5 = sadd.s32 1, %s743_s19  ;;  %s170_s29 = int_to_ptr.vmem [resolvable:$true] %s169_s29 }
  0x12   : > { %s1031_s27 = scalar_select %p837_p8, 1, 0 }
  0x13   : > { %p525_p9 = pneg %p837_p8  ;;  %s603_s8 = scalar_lea.hbm %s1019_s1, 256 }
  0x14   : > { %p604_p12 = scmp.ne.s32.totalorder %s1019_s1, %s603_s8  ;;  %p610_p5 = scmp.lt.u32.totalorder %s603_s8, %s1019_s1 }
  0x15   : > { %p846_p11 = pnand %p525_p9, %p817_p1 }
  0x17   : > { %p605_p13 = pneg %p846_p11 }
  0x19   : > { %p606_p0 = pnand %p605_p13, %p604_p12 }
  0x1b   : > { %p607_p3 = pneg %p606_p0 }
  0x1d   : > { %p612_p7 = pnand %p610_p5, %p607_p3 }
  0x1f   : > { %615 = shalt.err (!%p612_p7)
}
  0x20   : > { %s616_s13 = scalar_lea.vmem %s170_s29, 256  ;;  %p624_p1 = scmp.lt.s32.totalorder %s170_s29, %s170_s29 }
  0x21   : > { %p617_p9 = scmp.ne.s32.totalorder %s170_s29, %s616_s13  ;;  %p625_p4 = scmp.lt.s32.totalorder %s616_s13, %s616_s13 }
  0x23   : > { %p619_p10 = pnand %p617_p9, %p605_p13  ;;  %p626_p8 = por %p625_p4, %p624_p1 }
  0x25   : > { %p620_p6 = pneg %p619_p10 }
  0x27   : > { %p627_p2 = pnand %p626_p8, %p620_p6 }
  0x29   : > { %630 = shalt.err (!%p627_p2)
}
  0x2a   : > { %s750_s14 = smov 64   ;;  %s751_s21 = smov 4  }
  0x2b   : > { %528 = dma.hbm_to_vmem [thread:$0]  (!%p846_p11), %s1019_s1, 256, %s170_s29, [#allocation6], %s750_s14, %s750_s14, %s751_s21  }
  0x2c   : > { %p35_p1 = scmp.ge.s32.totalorder %s33_s5, 2  ;;  %s42_s6 = sadd.s32 1, %s735_s17 }
  0x2d   : > { %p49_p2 = scmp.ne.s32.totalorder %s735_s17, %s731_s16  ;;  %p50_p4 = scmp.eq.s32.totalorder %s747_s20, 0 }
  0x2e   : > { %s1048_s5 = smov (%p35_p1, %s33_s5), 0  ;;  %p1034_p8 = scmp.ne.s32.totalorder %s1028_s24, 0 }
  0x2f   : > { %p876_p6 = por %p50_p4, %p49_p2  ;;  %s37_s8 = ssub.s32 %s743_s19, %s1048_s5 }
  0x30   : > { %p882_p10 = por %p1034_p8, %p49_p2  ;;  %p538_p12 = scmp.lt.s32.totalorder %s747_s20, 2 }
  0x31   : > { %p40_p11 = scmp.eq.s32.totalorder %s37_s8, 0  ;;  %s189_s29 = sand.u32 1, %s735_s17  }
  0x32   : > { %s482_s9 = sshll.u32 %s189_s29, 3  ;;  %s502_s11 = sshll.u32 %s743_s19, 7 }
  0x33   : > { %s891_s10 = scalar_select %p40_p11, %s735_s17, %s42_s6  }
  0x34   : > { %s897_s22 = scalar_lea.hbm %s1018_s0, %s502_s11  ;;  %s193_s24 = scalar_lea.vmem [#allocation2], %s482_s9 }
  0x35   : > { %s202_s28 = sshll.u32 %s193_s24, 4  ;;  %p903_p13 = pnand %p538_p12, %p876_p6  ;;  %s899_s28 = int_to_ptr.vmem [resolvable:$true] %s202_s28 }
  0x36   : > { %s907_s6 = scalar_lea.sflag [#allocation3], %s189_s29  ;;  %s631_s12 = scalar_lea.hbm %s897_s22, 128 }
  0x37   : > { %p632_p0 = scmp.ne.s32.totalorder %s897_s22, %s631_s12  ;;  %p633_p3 = pneg %p903_p13 }
  0x38   : > { %s636_s7 = scalar_lea.hbm %s1018_s0, 256  ;;  %p637_p9 = scmp.lt.u32.totalorder %s897_s22, %s1018_s0 }
  0x39   : > { %p634_p5 = pnand %p633_p3, %p632_p0  ;;  %p638_p1 = scmp.lt.u32.totalorder %s636_s7, %s631_s12 }
  0x3a   : > { %p640_p4 = scmp.lt.u32.totalorder %s631_s12, %s897_s22 }
  0x3b   : > { %p635_p7 = pneg %p634_p5  ;;  %p639_p2 = por %p638_p1, %p637_p9 }
  0x3d   : > { %p641_p6 = por %p640_p4, %p639_p2 }
  0x3f   : > { %p642_p8 = pnand %p641_p6, %p635_p7 }
  0x41   : > { %645 = shalt.err (!%p642_p8)
}
  0x42   : > { %s646_s29 = scalar_lea.vmem %s899_s28, 128  ;;  %s752_s9 = smov [#allocation2]  }
  0x43   : > { %p647_p12 = scmp.ne.s32.totalorder %s899_s28, %s646_s29  ;;  %s651_s11 = sshll.u32 %s752_s9, 4  ;;  %s652_s11 = int_to_ptr.vmem [resolvable:$false] %s651_s11 }
  0x44   : > { %s653_s13 = scalar_lea.vmem %s652_s11, 256  ;;  %p654_p5 = scmp.lt.s32.totalorder %s899_s28, %s652_s11 }
  0x45   : > { %p649_p11 = pnand %p647_p12, %p633_p3  ;;  %p655_p9 = scmp.lt.s32.totalorder %s653_s13, %s646_s29 }
  0x47   : > { %p650_p0 = pneg %p649_p11  ;;  %p656_p1 = por %p655_p9, %p654_p5 }
  0x49   : > { %p657_p2 = pnand %p656_p1, %p650_p0 }
  0x4b   : > { %660 = shalt.err (!%p657_p2)
}
  0x4c   : > { %532 = dma.hbm_to_vmem [thread:$0]  (!%p903_p13), %s897_s22, 128, %s899_s28, %s907_s6, %s750_s14, %s750_s14, %s751_s21  }
  0x4d   : > { %p1037_p3 = scmp.ne.s32.totalorder %s1031_s27, 0 }
  0x4e   : > { %s941_s12 = sand.u32 (!%p1037_p3), 1, %s731_s16   ;;  %p1038_p7 = scmp.ne.s32.totalorder (!%p1037_p3), %s1029_s25, 0 }
  0x4f   : > { %214 = sbr.rel (%p1037_p3) target bundleno = 498 (0x1f2), region = 36  ;;  %s486_s7 = sshll.u32 (!%p1037_p3), %s941_s12, 3 }
  0x50   : > { %s217_s24 = scalar_lea.sflag (!%p1037_p3), [#allocation3], %s941_s12  ;;  %s220_s8 = scalar_lea.vmem (!%p1037_p3), [#allocation2], %s486_s7 }
  0x56   : > { %714 = dma.done.wait (%p1038_p7), %s217_s24, 128  }
  0x57   : > { %716 = vsyncadd (%p1038_p7), %s217_s24, 4294967168  ;;  %p1039_p13 = scmp.ne.s32.totalorder %s1027_s23, 0 }
  0x59   : > { %718 = dma.done.wait (%p1039_p13), [#allocation6], 256  }
  0x5a   : > { %720 = vsyncadd (%p1039_p13), [#allocation6], 4294967040  ;;  %v753_v0 = vmov 0.0   ;;  %vm754_vm0 = vmmov 0   ;;  %v596_v1 = vld [vmem:[#allocation5] sm:$0xff]   ;;  %v597_v2 = vld [vmem:[#allocation5 + $0x8] sm:$0xff]  }
  0x5b   : > { %509 = vmatprep.subr.bf16.mxu0 %v753_v0  ;;  %513 = vmatprep.mubr.msk.bf16.mxu0 %vm754_vm0, %v753_v0  ;;  %v598_v3 = vld [vmem:[%s220_s8] sm:$0xff]   ;;  %vm282_vm1 = vcmask 261120   ;;  %vm361_vm2 = vcmask 257024   ;;  %s505_s21 = sshll.u32 %s739_s18, 7  ;;  %s248_s22 = scalar_lea.vmem [#allocation7], %s486_s7 }
  0x5c   : > { %510 = vmatpush3.bf16.msra.mxu0 %v596_v1  ;;  %v489_v4 = vld [vmem:[%s1020_s2] ss:$0 sm:$0xff]  ;;  %s380_s28 = sshll.u32 %s248_s22, 4  ;;  %s967_s9 = scalar_lea.hbm %s1022_s4, %s505_s21  ;;  %s969_s28 = int_to_ptr.vmem [resolvable:$true] %s380_s28 }
  0x5d   : > { %511 = vmatprep.subr.bf16.mxu0 %v753_v0  ;;  %v494_v22 = vld [vmem:[%s1021_s3] ss:$0 sm:$0xff]  ;;  %s365_s11 = scalar_lea.sflag [#allocation4], %s941_s12  ;;  %s661_s13 = scalar_lea.vmem %s969_s28, 128 }
  0x5e   : > { %p662_p4 = scmp.ne.s32.totalorder %s969_s28, %s661_s13  ;;  %s755_s18 = smov [#allocation7]  }
  0x5f   : > { %s665_s7 = sshll.u32 %s755_s18, 4  ;;  %s666_s7 = int_to_ptr.vmem [resolvable:$false] %s665_s7 }
  0x60   : > { %512 = vmatpush3.bf16.msra.mxu0 %v597_v2  ;;  %p663_p6 = pnand %p662_p4, %p882_p10  ;;  %s667_s24 = scalar_lea.vmem %s666_s7, 256 }
  0x61   : > { %p668_p12 = scmp.lt.s32.totalorder %s969_s28, %s666_s7  ;;  %p669_p11 = scmp.lt.s32.totalorder %s667_s24, %s661_s13 }
  0x62   : > { %p664_p8 = pneg %p663_p6 }
  0x63   : > { %514 = vmatmul.mubr.msk.bf16.vlgmr.msra.gmra.mrb[0].mxu0 %vm282_vm1, %v598_v3  ;;  %p670_p0 = por %p669_p11, %p668_p12 }
  0x65   : > { %p671_p5 = pnand %p670_p0, %p664_p8 }
 0x136   : > { %v320_v5 = vpop.f32.mrb[0].mxu0 }
 0x137   : > { %v321_v6 = vadd.f32 %v489_v4, %v320_v5  ;;  %v515_v7 = vpop.f32.mrb[1].mxu0 }
 0x138   : > { %v323_v8 = vpop.f32.mrb[2].mxu0 }
 0x139   : > { %v324_v9 = vadd.f32 %v489_v4, %v323_v8  ;;  %v516_v10 = vpop.f32.mrb[3].mxu0  ;;  %v327_v11 = vmul.f32 %v321_v6, %v321_v6 }
 0x13b   : > { %v329_v12 = vsel %vm282_vm1, %v327_v11, 0.0  ;;  %v328_v13 = vmul.f32 %v324_v9, %v324_v9 }
 0x13c   : > { %330 = vadd.xlane.f32.xlu0 %v329_v12 }
 0x13d   : > { %v332_v14 = vsel %vm282_vm1, %v328_v13, 0.0 }
 0x140   : > { %333 = vadd.xlane.f32.xlu0 %v332_v14 }
 0x1c9   : > { %v331_v15 = vpop.xlane.xlu0 %330 }
 0x1ca   : > { %v336_v16 = vmul.f32 0.03125, %v331_v15 }
 0x1cc   : > { %v338_v17 = vadd.f32 1e-06, %v336_v16 }
 0x1cd   : > { %v334_v18 = vpop.xlane.xlu0 %333 }
 0x1ce   : > { %599 = vrsqrt.f32 %v338_v17  ;;  %v337_v19 = vmul.f32 0.03125, %v334_v18 }
 0x1d0   : > { %v339_v20 = vadd.f32 1e-06, %v337_v19 }
 0x1d2   : > { %601 = vrsqrt.f32 %v339_v20 }
 0x1d8   : > { %v600_v21 = vpop.eup %599 }
 0x1d9   : > { %v342_v23 = vmul.f32 %v600_v21, %v321_v6 }
 0x1db   : > { %v351_v24 = vmul.f32 %v494_v22, %v342_v23 }
 0x1dc   : > { %v602_v25 = vpop.eup %601 }
 0x1dd   : > { %v503_v26 = vpack.c.bf16 %v351_v24, %v351_v24  ;;  %v343_v27 = vmul.f32 %v602_v25, %v324_v9 }
 0x1df   : > { %v352_v28 = vmul.f32 %v494_v22, %v343_v27  ;;  %362 = vst.msk [vmem:[%s248_s22] sm:$0xf] %vm361_vm2, %v503_v26 }
 0x1e1   : > { %v504_v29 = vpack.c.bf16 %v352_v28, %v352_v28 }
 0x1e3   : > { %363 = vst.msk [vmem:[%s248_s22 + $0x4] sm:$0xf] %vm361_vm2, %v504_v29 }
 0x1e4   : > { %674 = shalt.err (!%p671_p5)
}
 0x1e5   : > { %s675_s8 = scalar_lea.hbm %s967_s9, 128  ;;  %s679_s23 = scalar_lea.hbm %s1022_s4, 256 }
 0x1e6   : > { %p676_p9 = scmp.ne.s32.totalorder %s967_s9, %s675_s8  ;;  %p680_p3 = scmp.lt.u32.totalorder %s967_s9, %s1022_s4 }
 0x1e7   : > { %p681_p7 = scmp.lt.u32.totalorder %s679_s23, %s675_s8  ;;  %p683_p4 = scmp.lt.u32.totalorder %s675_s8, %s967_s9 }
 0x1e8   : > { %p677_p1 = pnand %p676_p9, %p882_p10 }
 0x1e9   : > { %p682_p13 = por %p681_p7, %p680_p3 }
 0x1ea   : > { %p678_p2 = pneg %p677_p1 }
 0x1eb   : > { %p684_p6 = por %p683_p4, %p682_p13 }
 0x1ed   : > { %p685_p8 = pnand %p684_p6, %p678_p2 }
 0x1ef   : > { %688 = shalt.err (!%p685_p8)
}
 0x1f0   : > { %s756_s22 = smov 64   ;;  %s757_s6 = smov 4  }
 0x1f1   : > { %523 = dma.vmem_to_hbm [thread:$0]  (%p882_p10), %s969_s28, 128, %s967_s9, %s365_s11, %s756_s22, %s756_s22, %s757_s6  }
 0x1f2 PF: > { %s395_s29 = sand.u32 1, %s727_s15   ;;  %p1040_p12 = scmp.ne.s32.totalorder %s1030_s26, 0 }
 0x1f3   : > { %p1041_p11 = scmp.ge.s32.totalorder %s747_s20, 2  ;;  %s396_s13 = scalar_lea.sflag [#allocation4], %s395_s29 }
 0x1f5   : > { %p534_p0 = pnand %p1041_p11, %p1040_p12 }
 0x1f7   : > { %722 = dma.done.wait (!%p534_p0), %s396_s13, 128  }
 0x1f8   : > { %724 = vsyncadd (!%p534_p0), %s396_s13, 4294967168  ;;  %s21_s20 = sadd.s32 1, %s747_s20   ;;  %s1042_s15 = smov %s731_s16 }
 0x1f9   : > { %p18_p5 = scmp.ge.s32.totalorder %s21_s20, 4   ;;  %s1043_s16 = smov %s735_s17 }
 0x1fa   : > { %s1044_s17 = smov %s891_s10  ;;  %s1045_s18 = smov %s743_s19 }
 0x1fb   : > { %s1046_s19 = smov %s1048_s5  ;;  %20 = sbr.rel (!%p18_p5) target bundleno = 7 (0x7), region = 85 }
 0x202   :  { %401 = vsyncpa [#allocation3], 1 }
 0x203   :  { %403 = vsyncpa [#allocation3 + $0x1], 1 }
 0x204   :  { %404 = vsyncpa [#allocation6], 1 }
 0x205   :  { %405 = vsyncpa [#allocation4], 1 }
 0x206   :  { %407 = vsyncpa [#allocation4 + $0x1], 1 }

</bundles_post_ra>
